<compile_context>
chip_gen: v7x
topology: tpu7x:2x2x1
jax: 0.10.0
libtpu: 0.0.40
codegen_flags: <defaults>
</compile_context>

<pallas_src>
import functools
import math

import jax
import jax.numpy as jnp
from jax import lax
from jax.experimental import pallas as pl
from jax.experimental.pallas import tpu as pltpu


def _directional_alignment_kernel(x_ref, w_ref, o_ref, *, w_dim, inv_dim):
    # x_ref: (TP, H, TB*W)  native dtype, lane-dense (batch folded into lanes)
    # w_ref: (TP, H, H)     same dtype as x (MXU operands must match)
    # o_ref: (TP, 1, H, TB)
    tp, h, tn = x_ref.shape
    tb = tn // w_dim

    x = x_ref[...]          # no explicit f32 cast; dot_general accumulates in f32
    wts = w_ref[...]

    # y[p, h, n] = sum_k wts[p, h, k] * x[p, k, n]
    # Batched MXU matmul with a wide lane-dense N dim; no weight broadcast,
    # no transpose of x.
    y = lax.dot_general(
        wts, x,
        dimension_numbers=(((2,), (1,)), ((0,), (0,))),
        preferred_element_type=jnp.float32,
    )                                                       # (TP, H, TN) f32

    prod = x * y                                            # promotes inline to f32

    # Per-batch reduction over each W-wide lane segment, expressed as a small
    # matmul against a 0/1 segment matrix (keeps everything lane-dense; avoids
    # lane-dim reshapes and any broadcast of per-plane data).
    n_idx = lax.broadcasted_iota(jnp.int32, (tn, tb), 0)
    b_idx = lax.broadcasted_iota(jnp.int32, (tn, tb), 1)
    seg = ((n_idx >= b_idx * w_dim) &
           (n_idx < (b_idx + 1) * w_dim)).astype(jnp.float32)   # (TN, TB)

    out = lax.dot_general(
        prod.reshape(tp * h, tn), seg,
        dimension_numbers=(((1,), (0,)), ((), ())),
        preferred_element_type=jnp.float32,
    )                                                       # (TP*H, TB) f32

    # Apply 1/sqrt(W) once on the f32 result (exact w.r.t. the reference).
    o_ref[...] = (out * inv_dim).reshape(tp, 1, h, tb).astype(o_ref.dtype)


def _tpu_generation():
    """Best-effort chip query -> (physical VMEM bytes per core, has 2 TensorCores)."""
    phys_vmem = 64 << 20          # conservative default (v7x has the smallest VMEM)
    try:
        info = pltpu.get_tpu_info()
        phys_vmem = int(getattr(info, "vmem_capacity_bytes", phys_vmem))
    except Exception:
        pass
    # v7x is the generation with 64 MiB VMEM per TensorCore and 2 TCs per chip;
    # v5e / v6e have 128 MiB and a single TensorCore.
    two_tc = phys_vmem <= (64 << 20)
    return phys_vmem, two_tc


def _choose_tiles(B, P, H, W, itemsize, budget_bytes, want_two_steps):
    """Pick (TP planes, TB batches) per grid step.

    Legality:
      * TP | P, TB | B.
      * x block (TP, H, TB*W): last dim must be 128-divisible or the full B*W.
      * weight block (TP, H, H) and out block (TP, 1, H, TB): last two dims are
        full array dims -> always legal.
    """
    legal_tb = [d for d in range(B, 0, -1)
                if B % d == 0 and (d == B or (d * W) % 128 == 0)]
    p_divs = [d for d in range(P, 0, -1) if P % d == 0]

    def footprint(tp, tb):
        x_blk = tp * H * tb * W * itemsize          # double-buffered input
        y_blk = tp * H * tb * W * 4                 # f32 y + f32 prod
        w_blk = tp * H * H * itemsize               # weight tile (resident)
        o_blk = tp * H * tb * 4
        return 2 * x_blk + 2 * y_blk + 2 * w_blk + 2 * o_blk

    pairs = [(tp, tb) for tp in p_divs for tb in legal_tb]
    fitting = [pr for pr in pairs if footprint(*pr) <= budget_bytes]
    cands = fitting if fitting else [min(pairs, key=lambda pr: footprint(*pr))]

    if want_two_steps:
        # 2 TensorCores (v7x): make sure both get work -> >= 2 grid steps,
        # preferring an even total step count.  Either the plane axis or the
        # batch-column axis may be split.  Single-TC chips skip this entirely.
        def steps(pr):
            return (P // pr[0]) * (B // pr[1])
        even = [pr for pr in cands if steps(pr) >= 2 and steps(pr) % 2 == 0]
        multi = [pr for pr in cands if steps(pr) >= 2]
        if even:
            cands = even
        elif multi:
            cands = multi

    tp, tb = max(cands, key=lambda pr: pr[0] * pr[1])
    return tp, tb, footprint(tp, tb)


def directional_alignment(x, weights):
    """x: (B, P, H, W), weights: (P, H, H) -> (B, P, H, 1)."""
    B, P, H, W = x.shape
    assert weights.shape == (P, H, H)

    phys_vmem, two_tc = _tpu_generation()
    if two_tc:                       # v7x-class: 64 MiB VMEM, 2 TensorCores
        budget, base_limit = 10 << 20, 44 << 20
    else:                            # v5e / v6e: 128 MiB VMEM (scoped default 16/32 MiB)
        budget, base_limit = 12 << 20, 80 << 20

    itemsize = jnp.dtype(x.dtype).itemsize
    tp, tb, step_bytes = _choose_tiles(B, P, H, W, itemsize, budget, two_tc)

    vmem_limit = max(base_limit, step_bytes + (4 << 20))
    vmem_limit = max(min(vmem_limit, phys_vmem - (16 << 20)), 32 << 20)

    nj = B // tb
    grid = (P // tp, nj)  # batch-column axis inner -> weight tile stays resident

    # Lane-dense input layout: one XLA transpose pass, (B,P,H,W) -> (P,H,B*W).
    x_t = jnp.transpose(x, (1, 2, 0, 3)).reshape(P, H, B * W)
    # MXU operands must share a dtype; the 1/sqrt(W) scale is applied in f32
    # inside the kernel, so no precision is lost by scaling the weights here.
    w_k = weights if weights.dtype == x.dtype else weights.astype(x.dtype)

    inv_dim = 1.0 / math.sqrt(float(W))
    kernel = functools.partial(_directional_alignment_kernel,
                               w_dim=W, inv_dim=inv_dim)

    flops = 2 * B * P * H * H * W + 4 * B * P * H * W
    bytes_accessed = (B * P * H * W * itemsize
                      + P * H * H * jnp.dtype(w_k.dtype).itemsize
                      + B * P * H * itemsize)

    out4 = pl.pallas_call(
        kernel,
        out_shape=jax.ShapeDtypeStruct((P, nj, H, tb), x.dtype),
        grid=grid,
        in_specs=[
            # x_t: (TP, H, TB*W) lane-dense tile.
            pl.BlockSpec((tp, H, tb * W), lambda i, j: (i, 0, j)),
            # weights: constant block index across the inner axis -> resident.
            pl.BlockSpec((tp, H, H), lambda i, j: (i, 0, 0)),
        ],
        # Full-dim trailing block dims -> always legal, single unmasked store.
        out_specs=pl.BlockSpec((tp, 1, H, tb), lambda i, j: (i, j, 0, 0)),
        compiler_params=pltpu.CompilerParams(
            dimension_semantics=("parallel", "parallel"),
            vmem_limit_bytes=int(vmem_limit),
        ),
        cost_estimate=pl.CostEstimate(
            flops=flops, transcendentals=0, bytes_accessed=bytes_accessed),
    )(x_t, w_k)

    # Tiny output permute back to (B, P, H, 1) (keepdim=True).
    out = jnp.transpose(out4, (1, 3, 0, 2)).reshape(B, P, H)
    return out[..., None]


def directional_alignment_ref(x, weights):
    inv_dim = 1.0 / math.sqrt(float(x.shape[-1]))
    gram = jnp.einsum("bphw,bpkw->bphk", x, x) * inv_dim
    scaled = gram * weights[None, ...]
    return jnp.sum(scaled, axis=-1, keepdims=True)


if __name__ == "__main__":
    # Small shapes: batch=2, planes=4, spatial H=W=16.
    B, P, H, W = 2, 4, 16, 16

    key = jax.random.PRNGKey(0)
    kx, kw = jax.random.split(key)

    x = jax.random.normal(kx, (B, P, H, W), dtype=jnp.float32)

    # Deterministic kaiming_normal_ equivalent for weights (P, H, H):
    # fan_in = H * H, std = sqrt(2 / fan_in).
    std = math.sqrt(2.0 / (H * H))
    weights = jax.random.normal(kw, (P, H, H), dtype=jnp.float32) * std

    fn = jax.jit(directional_alignment)
    out = jax.block_until_ready(fn(x, weights))
    ref = directional_alignment_ref(x, weights)

    assert out.shape == (B, P, H, 1), out.shape
    assert jnp.allclose(out, ref, atol=1e-4, rtol=1e-5), (
        float(jnp.max(jnp.abs(out - ref)))
    )

    print("KERNEL_OK")
</pallas_src>

<mosaic_0001>
module attributes {stable_mosaic.version = 11 : i64} {
  func.func @_directional_alignment_kernel(%arg0: i32, %arg1: i32, %arg2: memref<2x16x32xf32, #tpu.memory_space<vmem>>, %arg3: memref<2x16x16xf32, #tpu.memory_space<vmem>>, %arg4: memref<2x1x16x2xf32, #tpu.memory_space<vmem>>) attributes {dimension_semantics = [#tpu.dimension_semantics<parallel>, #tpu.dimension_semantics<parallel>], iteration_bounds = array<i64: 2, 1>, scalar_prefetch = 0 : i64, scratch_operands = 0 : i64, tpu.core_type = #tpu.core_type<tc>, window_params = [{transform_indices = @transform_0, window_bounds = array<i64: 2, 16, 32>}, {transform_indices = @transform_1, window_bounds = array<i64: 2, 16, 16>}, {transform_indices = @transform_2, window_bounds = array<i64: 2, 1, 16, 2>}]} {
    %c0 = arith.constant 0 : index
    %c0_0 = arith.constant 0 : index
    %c0_1 = arith.constant 0 : index
    %0 = vector.load %arg2[%c0, %c0_0, %c0_1] : memref<2x16x32xf32, #tpu.memory_space<vmem>>, vector<2x16x32xf32>
    %c0_2 = arith.constant 0 : index
    %c0_3 = arith.constant 0 : index
    %c0_4 = arith.constant 0 : index
    %1 = vector.load %arg3[%c0_2, %c0_3, %c0_4] : memref<2x16x16xf32, #tpu.memory_space<vmem>>, vector<2x16x16xf32>
    %cst = arith.constant dense<0.000000e+00> : vector<2x16x32xf32>
    %2 = tpu.matmul %1, %0, %cst {dimension_numbers = #tpu.dot_dimension_numbers<[2], [1], [1], [2], [0, 0, 0, 1, 1, 2], [0], [0]>} : vector<2x16x16xf32>, vector<2x16x32xf32>, vector<2x16x32xf32> -> vector<2x16x32xf32>
    %3 = arith.mulf %0, %2 : vector<2x16x32xf32>
    %4 = tpu.iota {dimensions = array<i32: 0>} : vector<32x2xi32>
    %5 = tpu.iota {dimensions = array<i32: 1>} : vector<32x2xi32>
    %c16_i32 = arith.constant 16 : i32
    %6 = vector.broadcast %c16_i32 : i32 to vector<32x2xi32>
    %7 = arith.muli %5, %6 : vector<32x2xi32>
    %8 = arith.cmpi sge, %4, %7 : vector<32x2xi32>
    %c1_i32 = arith.constant 1 : i32
    %9 = vector.broadcast %c1_i32 : i32 to vector<32x2xi32>
    %10 = arith.addi %5, %9 : vector<32x2xi32>
    %c16_i32_5 = arith.constant 16 : i32
    %11 = vector.broadcast %c16_i32_5 : i32 to vector<32x2xi32>
    %12 = arith.muli %10, %11 : vector<32x2xi32>
    %13 = arith.cmpi slt, %4, %12 : vector<32x2xi32>
    %14 = arith.andi %8, %13 : vector<32x2xi1>
    %15 = arith.extui %14 : vector<32x2xi1> to vector<32x2xi32>
    %16 = arith.sitofp %15 : vector<32x2xi32> to vector<32x2xf32>
    %17 = vector.shape_cast %3 : vector<2x16x32xf32> to vector<32x32xf32>
    %cst_6 = arith.constant dense<0.000000e+00> : vector<32x2xf32>
    %18 = tpu.matmul %17, %16, %cst_6 {dimension_numbers = #tpu.dot_dimension_numbers<[1], [0], [0], [1], [0, 0, 1, 1], [], []>} : vector<32x32xf32>, vector<32x2xf32>, vector<32x2xf32> -> vector<32x2xf32>
    %cst_7 = arith.constant 2.500000e-01 : f32
    %19 = vector.broadcast %cst_7 : f32 to vector<32x2xf32>
    %20 = arith.mulf %18, %19 : vector<32x2xf32>
    %21 = vector.shape_cast %20 : vector<32x2xf32> to vector<2x1x16x2xf32>
    %c0_8 = arith.constant 0 : index
    %c0_9 = arith.constant 0 : index
    %c0_10 = arith.constant 0 : index
    %c0_11 = arith.constant 0 : index
    %22 = vector.load %arg4[%c0_8, %c0_9, %c0_10, %c0_11] : memref<2x1x16x2xf32, #tpu.memory_space<vmem>>, vector<2x1x16x2xf32>
    tpu.vector_store %arg4[%c0_8, %c0_9, %c0_10, %c0_11], %21 {strides = array<i32>} : memref<2x1x16x2xf32, #tpu.memory_space<vmem>>, vector<2x1x16x2xf32>,
    return
  }
  func.func @transform_0(%arg0: i32, %arg1: i32) -> (i32, i32, i32) {
    %c0_i32 = arith.constant 0 : i32
    %c0_i32_0 = arith.constant 0 : i32
    return %arg0, %c0_i32, %arg1 : i32, i32, i32
  }
  func.func @transform_1(%arg0: i32, %arg1: i32) -> (i32, i32, i32) {
    %c0_i32 = arith.constant 0 : i32
    %c0_i32_0 = arith.constant 0 : i32
    %c0_i32_1 = arith.constant 0 : i32
    return %arg0, %c0_i32, %c0_i32_0 : i32, i32, i32
  }
  func.func @transform_2(%arg0: i32, %arg1: i32) -> (i32, i32, i32, i32) {
    %c0_i32 = arith.constant 0 : i32
    %c0_i32_0 = arith.constant 0 : i32
    %c0_i32_1 = arith.constant 0 : i32
    return %arg0, %arg1, %c0_i32, %c0_i32_0 : i32, i32, i32, i32
  }
}

</mosaic_0001>

<bundles_post_ra>
// kernel: directional_alignment.1
= control target key start
LH: loop header
LB: loop body
LE: loop exit
PB: predicated region body
PF: predicated region fallthrough
CT: control target
= control target key end

     0   :  { %s787_s9 = smov 0   ;;  %s789_s10 = smov 0   ;;  %s832_s0 = inlined_call_operand.vmem [shape: f32[4,16,32], index: 0, kind: input, shape index: {}]   ;;  %s833_s1 = inlined_call_operand.vmem [shape: f32[4,16,16], index: 1, kind: input, shape index: {}]   ;;  %s834_s2 = inlined_call_operand.vmem [shape: f32[4,1,16,2], index: 2, kind: output, shape index: {}]  }
   0x1   :  { %s791_s11 = smov 0  }
   0x2 LB: > { %s24_s12 = sadd.s32 1, %s765_s10  ;;  %p631_p0 = scmp.ge.s32.totalorder %s769_s11, 1  ;;  %s769_s11 = sphi %s791_s11, %s12_s11   ;;  %s765_s10 = sphi %s789_s10, %s836_s10   ;;  %s761_s9 = sphi %s787_s9, %s835_s9  }
   0x3   : > { %p26_p1 = scmp.ge.s32.totalorder %s24_s12, 2  ;;  %p145_p2 = scmp.lt.s32.totalorder %s769_s11, 3 }
   0x5   : > { %s838_s12 = smov (%p26_p1, %s24_s12), 0  ;;  %p146_p3 = pnand %p631_p0, %p145_p2 }
   0x6   : > { %s632_s13 = sshll.u32 (!%p146_p3), %s761_s9, 1  ;;  %v385_v0 = vlaneseq (!%p146_p3)  ;;  %vm218_vm0 = vcmask (!%p146_p3), 130048   ;;  %v771_v16 = vmov (!%p146_p3), 1.0|1.0   ;;  %vm415_vm15 = vcmask (!%p146_p3), 261120  }
   0x7   : > { %149 = sbr.rel (%p146_p3) target bundleno = 460 (0x1cc), region = 28  ;;  %p183_p4 = scmp.lt.s32.totalorder (!%p146_p3), %s632_s13, 3 }
   0x8   : > { %v386_v1 = vshrl.u32 (!%p146_p3), %v385_v0, 7  ;;  %v391_v2 = vand.u32 (!%p146_p3), 127, %v385_v0 }
   0xa   : > { %v387_v3 = vadd.s32 (!%p146_p3), 8, %v386_v1  ;;  %v392_v4 = vmul.u32 (!%p146_p3), 16, %v391_v2  ;;  %v397_v5 = vadd.s32 (!%p146_p3), 1, %v391_v2  ;;  %v388_v18 = vadd.s32 (!%p146_p3), 16, %v386_v1 }
   0xb   : > { %v389_v19 = vadd.s32 (!%p146_p3), 24, %v386_v1 }
   0xc   : > { %vm393_vm1 = vcmp.ge.s32.totalorder (!%p146_p3), %v386_v1, %v392_v4  ;;  %v398_v6 = vmul.u32 (!%p146_p3), 16, %v397_v5  ;;  %vm394_vm2 = vcmp.ge.s32.totalorder (!%p146_p3), %v387_v3, %v392_v4  ;;  %vm395_vm8 = vcmp.ge.s32.totalorder (!%p146_p3), %v388_v18, %v392_v4 }
   0xd   : > { %vm396_vm9 = vcmp.ge.s32.totalorder (!%p146_p3), %v389_v19, %v392_v4 }
   0xe   : > { %s840_s13 = smov (!%p183_p4, %s632_s13), 3  ;;  %vm399_vm3 = vcmp.lt.s32.totalorder %v386_v1, %v398_v6  ;;  %vm400_vm4 = vcmp.lt.s32.totalorder %v387_v3, %v398_v6  ;;  %vm401_vm10 = vcmp.lt.s32.totalorder %v388_v18, %v398_v6  ;;  %vm402_vm11 = vcmp.lt.s32.totalorder %v389_v19, %v398_v6 }
   0xf   : > { %s805_s14 = sshll.u32 %s840_s13, 4  ;;  %vm403_vm5 = vmand %vm393_vm1, %vm399_vm3 }
  0x10   : > { %s190_s17 = scalar_lea.vmem %s832_s0, %s805_s14  ;;  %s197_s20 = scalar_lea.vmem %s833_s1, %s805_s14  ;;  %vm404_vm6 = vmand %vm394_vm2, %vm400_vm4 }
  0x11   : > { %v210_v7 = vld [vmem:[%s190_s17] sm:$0xff]  ;;  %v211_v8 = vld [vmem:[%s190_s17 + $0x8] sm:$0xff]  ;;  %v212_v11 = vld [vmem:[%s190_s17 + $0x10] sm:$0xff]  ;;  %s208_s23 = scalar_lea.vmem %s834_s2, %s805_s14 }
  0x12   : > { %v214_v9 = vld [vmem:[%s197_s20] sm:$0xff]  ;;  %v706_v10 = vpack.c.bf16 %v211_v8, %v210_v7  ;;  %v213_v12 = vld [vmem:[%s190_s17 + $0x18] sm:$0xff]  ;;  %v215_v14 = vld [vmem:[%s197_s20 + $0x8] sm:$0xff] }
  0x13   : > { %682 = vmatprep.mubr.msk.f32.mxu1 %vm218_vm0, %v214_v9  ;;  %v710_v13 = vpack.c.bf16 %v213_v12, %v212_v11  ;;  %vm714_vm7 = vmpackc.low %vm404_vm6, %vm403_vm5  ;;  %v216_v15 = vld [vmem:[%s197_s20 + $0x10] sm:$0xff]  ;;  %v217_v17 = vld [vmem:[%s197_s20 + $0x18] sm:$0xff] }
  0x14   : > { %707 = vmatprep.subr.bf16.mxu1 %v706_v10  ;;  %715 = vmatprep.subr.msk.bf16.mxu0 %vm714_vm7, %v771_v16  ;;  %vm405_vm12 = vmand %vm395_vm8, %vm401_vm10 }
  0x15   : > { %709 = vmatpush3.bf16.msra.mxu1 %v706_v10  ;;  %717 = vmatpush3.bf16.msk.msra.mxu0 %vm714_vm7, %v771_v16  ;;  %vm406_vm13 = vmand %vm396_vm9, %vm402_vm11 }
  0x16   : > { %711 = vmatprep.subr.bf16.mxu1 %v710_v13  ;;  %vm718_vm14 = vmpackc.low %vm406_vm13, %vm405_vm12 }
  0x17   : > { %719 = vmatprep.subr.msk.bf16.mxu0 %vm718_vm14, %v771_v16 }
  0x18   : > { %683 = vmatmul.mubr.msk.f32.vlgmr.msra.gmra.mrb[0].mxu1 %vm218_vm0, %v215_v14 }
  0x19   : > { %713 = vmatpush3.bf16.msra.mxu1 %v710_v13  ;;  %689 = vmatprep.mubr.msk.f32.mxu1 %vm218_vm0, %v216_v15 }
  0x1a   : > { %721 = vmatpush3.bf16.msk.msra.mxu0 %vm718_vm14, %v771_v16 }
  0x1c   : > { %690 = vmatmul.mubr.msk.f32.vlgmr.msra.gmra.mrb[2].mxu1 %vm218_vm0, %v217_v17  ;;  %vm517_vm0 = vcmask 15360  }
  0xeb   : > { %v684_v20 = vpop.f32.mrb[0].mxu1 }
  0xec   : > { %v291_v21 = vpop.f32.mrb[1].mxu1  ;;  %v382_v23 = vmul.f32 %v684_v20, %v211_v8 }
  0xed   : > { %v381_v22 = vmul.f32 %v291_v21, %v210_v7 }
  0xef   : > { %v691_v24 = vpop.f32.mrb[2].mxu1  ;;  %700 = vmatprep.mubr.msk.f32.mxu0 %vm415_vm15, %v381_v22 }
  0xf0   : > { %v372_v25 = vpop.f32.mrb[3].mxu1  ;;  %701 = vmatmul.mubr.msk.f32.vlgmr.msra.gmra.mrb[0].mxu0 %vm415_vm15, %v382_v23  ;;  %v384_v27 = vmul.f32 %v691_v24, %v213_v12 }
  0xf1   : > { %v383_v26 = vmul.f32 %v372_v25, %v212_v11 }
  0xf3   : > { %703 = vmatprep.mubr.msk.f32.mxu0 %vm415_vm15, %v383_v26 }
  0xf4   : > { %704 = vmatmul.mubr.msk.f32.gmra.mrb[2].mxu0 %vm415_vm15, %v384_v27 }
 0x1c3   : > { %v702_v28 = vpop.f32.mrb[0].mxu0 }
 0x1c4   : > { %v514_v29 = vmul.f32 0.25, %v702_v28  ;;  %v494_v30 = vpop.f32.mrb[1].mxu0 }
 0x1c5   : > { %v513_v31 = vmul.f32 0.25, %v494_v30 }
 0x1c6   : > { %519 = vst.msk [vmem:[%s208_s23 + $0x8] sm:$0xff] %vm517_vm0, %v514_v29 }
 0x1c7   : > { %518 = vst.msk [vmem:[%s208_s23] sm:$0xff] %vm517_vm0, %v513_v31  ;;  %v705_v32 = vpop.f32.mrb[2].mxu0 }
 0x1c8   : > { %v516_v33 = vmul.f32 0.25, %v705_v32  ;;  %v504_v34 = vpop.f32.mrb[3].mxu0 }
 0x1c9   : > { %v515_v35 = vmul.f32 0.25, %v504_v34 }
 0x1ca   : > { %521 = vst.msk [vmem:[%s208_s23 + $0x18] sm:$0xff] %vm517_vm0, %v516_v33 }
 0x1cb   : > { %520 = vst.msk [vmem:[%s208_s23 + $0x10] sm:$0xff] %vm517_vm0, %v515_v35 }
 0x1cc PF: > { %s12_s11 = sadd.s32 1, %s769_s11   ;;  %s835_s9 = smov %s765_s10 }
 0x1cd   : > { %p9_p5 = scmp.ge.s32.totalorder %s12_s11, 4   ;;  %s836_s10 = smov %s838_s12 }
 0x1cf   :  { %11 = sbr.rel (!%p9_p5) target bundleno = 2 (0x2), region = 61 }

</bundles_post_ra>
